<compile_context>
chip_gen: v5e
topology: v5e:2x2
jax: 0.10.0
libtpu: 0.0.40
codegen_flags: <defaults>
</compile_context>

<pallas_src>
import functools

import jax
import jax.numpy as jnp
from jax import lax
from jax.experimental import pallas as pl
from jax.experimental.pallas import tpu as pltpu

_LANE = 128
_SUBLANE = 8
_BOXES_PER_ROW = _LANE // 4                    # 32 boxes per (., 128) row
_ROW_QUANTUM = _SUBLANE * _BOXES_PER_ROW       # 256 boxes -> 8 full rows

_TB_DEFAULT = 8192        # rows/block: 4 MiB/input block (262144 boxes/step)
_TB_BIG = 16384           # only on 128-MiB-VMEM parts (v5e / v6e)
_VMEM_LIMIT_DEFAULT = 40 << 20
_VMEM_LIMIT_BIG = 64 << 20


def _wasserstein_kernel(pred_ref, targ_ref, out_ref, *, eps, neg_inv_constant,
                        loss_weight):
    # Blocks are (TB, 128) f32 in the natural (N, 4) memory order: lane 4*b+c
    # holds coordinate c of box 32*row + b.  Using
    #   W2 = 0.5 * sum_c (pred_c - target_c)^2 + eps
    # no de-interleave is needed at all.
    d = pred_ref[...] - targ_ref[...]          # (TB, 128) interleaved diffs
    q = d * d

    # Segment-sum each group of 4 lanes (one box) and compact to 32 dense
    # lanes via a constant (128, 32) selection matmul with entries 0.5/0.0.
    # MXU is otherwise idle here; cost is negligible vs. the block DMA.
    row = lax.broadcasted_iota(jnp.int32, (_LANE, _BOXES_PER_ROW), 0)
    col = lax.broadcasted_iota(jnp.int32, (_LANE, _BOXES_PER_ROW), 1)
    r = row - 4 * col
    sel = jnp.logical_and(r >= 0, r < 4).astype(jnp.float32) * 0.5

    w2 = jnp.dot(q, sel, preferred_element_type=jnp.float32) + eps   # (TB, 32)

    # mode == 'exp' (module default); divide folded into neg_inv_constant.
    loss = loss_weight * (1.0 - jnp.exp(jnp.sqrt(w2) * neg_inv_constant))
    out_ref[...] = loss.astype(out_ref.dtype)


def _hw_config():
    """Returns (num_tensorcores, target_block_rows, vmem_limit_bytes)."""
    kind = ""
    try:
        kind = (jax.devices()[0].device_kind or "").lower().replace(" ", "")
    except Exception:
        pass
    is_v7 = ("v7" in kind) or ("tpu7" in kind)
    num_cores = 2 if is_v7 else 1          # only v7x exposes 2 TCs per device

    target_rows, vmem_limit = _TB_DEFAULT, _VMEM_LIMIT_DEFAULT
    if not is_v7:
        vmem_bytes = 0
        try:
            vmem_bytes = int(pltpu.get_tpu_info().vmem_capacity_bytes)
        except Exception:
            vmem_bytes = 0
        if vmem_bytes >= 100 * 1024 * 1024:        # 128-MiB parts (v5e / v6e)
            target_rows, vmem_limit = _TB_BIG, _VMEM_LIMIT_BIG
    return num_cores, target_rows, vmem_limit


def _choose_block_rows(m_rows, target_rows, num_cores):
    """m_rows is a multiple of 8; returns a block row count (multiple of 8)."""
    if m_rows <= _SUBLANE:
        return m_rows                              # one tiny block
    if m_rows > target_rows:
        return target_rows                         # many steps; megacore shards them
    if num_cores >= 2 and m_rows >= 2 * _SUBLANE:
        # Single-step problem on a 2-TC part: split into near-equal
        # multiple-of-8 blocks so the "parallel" axis covers both cores.
        per_core = pl.cdiv(m_rows, num_cores)
        return ((per_core + _SUBLANE - 1) // _SUBLANE) * _SUBLANE
    return m_rows                                  # single block on 1-TC parts


@functools.partial(jax.jit,
                   static_argnames=("eps", "constant", "loss_weight",
                                    "block_rows"))
def _wasserstein_loss_impl(pred, target, eps, constant, loss_weight,
                           block_rows=None):
    n = pred.shape[0]
    n_pad = ((n + _ROW_QUANTUM - 1) // _ROW_QUANTUM) * _ROW_QUANTUM
    m_rows = n_pad // _BOXES_PER_ROW

    num_cores, target_rows, vmem_limit = _hw_config()
    tb = (block_rows if block_rows is not None
          else _choose_block_rows(m_rows, target_rows, num_cores))

    def prep(x):
        x = x.astype(jnp.float32)
        if n_pad != n:
            x = jnp.pad(x, ((0, n_pad - n), (0, 0)))
        # Free reshape: (n_pad, 4) and (m_rows, 128) are the same contiguous
        # row-major buffer — no HBM->HBM relayout pass.
        return x.reshape(m_rows, _LANE)

    kernel = functools.partial(
        _wasserstein_kernel,
        eps=float(eps),
        neg_inv_constant=-1.0 / float(constant),
        loss_weight=float(loss_weight),
    )

    out = pl.pallas_call(
        kernel,
        out_shape=jax.ShapeDtypeStruct((m_rows, _BOXES_PER_ROW), jnp.float32),
        grid_spec=pltpu.PrefetchScalarGridSpec(
            num_scalar_prefetch=0,
            grid=(pl.cdiv(m_rows, tb),),
            in_specs=[
                pl.BlockSpec((tb, _LANE), lambda i: (i, 0)),
                pl.BlockSpec((tb, _LANE), lambda i: (i, 0)),
            ],
            out_specs=pl.BlockSpec((tb, _BOXES_PER_ROW), lambda i: (i, 0)),
        ),
        compiler_params=pltpu.CompilerParams(
            dimension_semantics=("parallel",),
            allow_input_fusion=[True, True],   # fuse pad/cast producers
            vmem_limit_bytes=vmem_limit,
        ),
    )(prep(pred), prep(target))

    return out.reshape(n_pad)[:n]


def wasserstein_loss_pallas(pred, target, *, eps=1e-6, constant=12.8,
                            loss_weight=1.0, block_rows=None):
    """pred, target: (N, 4) xyxy boxes -> per-box loss (N,) (mode='exp').

    Matches WassersteinLoss.forward with weight=None.  `block_rows` is a test
    hook to force small blocks / multi-step grids at small N.
    """
    assert pred.shape == target.shape and pred.ndim == 2 and pred.shape[-1] == 4
    return _wasserstein_loss_impl(pred, target, float(eps), float(constant),
                                  float(loss_weight), block_rows=block_rows)


def _reference(pred, target, eps=1e-6, constant=12.8, loss_weight=1.0):
    """Literal jnp translation of the PyTorch wasserstein_loss (mode='exp')."""
    pred = pred.astype(jnp.float32)
    target = target.astype(jnp.float32)
    center1 = (pred[:, :2] + pred[:, 2:]) / 2
    center2 = (target[:, :2] + target[:, 2:]) / 2
    whs = center1 - center2
    center_distance = whs[:, 0] ** 2 + whs[:, 1] ** 2 + eps
    w1 = pred[:, 2] - pred[:, 0] + eps
    h1 = pred[:, 3] - pred[:, 1] + eps
    w2 = target[:, 2] - target[:, 0] + eps
    h2 = target[:, 3] - target[:, 1] + eps
    wh_distance = ((w1 - w2) ** 2 + (h1 - h2) ** 2) / 4
    wasserstein_2 = center_distance + wh_distance
    return loss_weight * (1.0 - jnp.exp(-jnp.sqrt(wasserstein_2) / constant))


def _make_boxes(key, n):
    k1, k2 = jax.random.split(key)
    xy = jax.random.uniform(k1, (n, 2), jnp.float32, 0.0, 20.0)
    wh = jax.random.uniform(k2, (n, 2), jnp.float32, 0.5, 10.0)
    return jnp.concatenate([xy, xy + wh], axis=1)          # (N, 4) xyxy


if __name__ == "__main__":
    key = jax.random.PRNGKey(0)
    kp1, kt1, kp2, kt2, kp3, kt3 = jax.random.split(key, 6)

    # Tolerance leaves headroom for MXU f32 pass precision in the tiny
    # selection matmul; real layout/semantics bugs would be O(1) off.
    tol = dict(atol=1e-4, rtol=1e-3)

    # Case 1: tiny, non-multiple-of-32 N (single 8-row block, padded tail).
    n1 = 37
    p1, t1 = _make_boxes(kp1, n1), _make_boxes(kt1, n1)
    l1 = wasserstein_loss_pallas(p1, t1)
    jax.block_until_ready(l1)
    assert l1.shape == (n1,)
    assert jnp.allclose(l1, _reference(p1, t1), **tol)

    # Case 2: mid-size N with the default (hardware-gated) block choice.
    n2 = 5000
    p2, t2 = _make_boxes(kp2, n2), _make_boxes(kt2, n2)
    l2 = wasserstein_loss_pallas(p2, t2)
    jax.block_until_ready(l2)
    assert l2.shape == (n2,)
    assert jnp.allclose(l2, _reference(p2, t2), **tol)

    # Case 3: force small blocks to exercise a multi-step grid with a partial
    # last block while keeping N small (m_rows=80, blocks of 32 -> 32/32/16).
    n3 = 2500
    p3, t3 = _make_boxes(kp3, n3), _make_boxes(kt3, n3)
    l3 = wasserstein_loss_pallas(p3, t3, block_rows=32)
    jax.block_until_ready(l3)
    assert l3.shape == (n3,)
    assert jnp.allclose(l3, _reference(p3, t3), **tol)

    print("KERNEL_OK")
</pallas_src>

<mosaic_0001>
module attributes {stable_mosaic.version = 11 : i64} {
  func.func @_wasserstein_kernel(%arg0: i32, %arg1: memref<8x128xf32, #tpu.memory_space<vmem>>, %arg2: memref<8x128xf32, #tpu.memory_space<vmem>>, %arg3: memref<8x32xf32, #tpu.memory_space<vmem>>) attributes {dimension_semantics = [#tpu.dimension_semantics<parallel>], iteration_bounds = array<i64: 1>, scalar_prefetch = 0 : i64, scratch_operands = 0 : i64, tpu.core_type = #tpu.core_type<tc>, window_params = [{transform_indices = @transform_0, window_bounds = array<i64: 8, 128>}, {transform_indices = @transform_1, window_bounds = array<i64: 8, 128>}, {transform_indices = @transform_2, window_bounds = array<i64: 8, 32>}]} {
    %c0 = arith.constant 0 : index
    %c0_0 = arith.constant 0 : index
    %0 = vector.load %arg1[%c0, %c0_0] : memref<8x128xf32, #tpu.memory_space<vmem>>, vector<8x128xf32>
    %c0_1 = arith.constant 0 : index
    %c0_2 = arith.constant 0 : index
    %1 = vector.load %arg2[%c0_1, %c0_2] : memref<8x128xf32, #tpu.memory_space<vmem>>, vector<8x128xf32>
    %2 = arith.subf %0, %1 : vector<8x128xf32>
    %3 = arith.mulf %2, %2 : vector<8x128xf32>
    %4 = tpu.iota {dimensions = array<i32: 0>} : vector<128x32xi32>
    %5 = tpu.iota {dimensions = array<i32: 1>} : vector<128x32xi32>
    %c4_i32 = arith.constant 4 : i32
    %6 = vector.broadcast %c4_i32 : i32 to vector<128x32xi32>
    %7 = arith.muli %6, %5 : vector<128x32xi32>
    %8 = arith.subi %4, %7 : vector<128x32xi32>
    %c0_i32 = arith.constant 0 : i32
    %9 = vector.broadcast %c0_i32 : i32 to vector<128x32xi32>
    %10 = arith.cmpi sge, %8, %9 : vector<128x32xi32>
    %c4_i32_3 = arith.constant 4 : i32
    %11 = vector.broadcast %c4_i32_3 : i32 to vector<128x32xi32>
    %12 = arith.cmpi slt, %8, %11 : vector<128x32xi32>
    %13 = arith.andi %10, %12 : vector<128x32xi1>
    %14 = arith.extui %13 : vector<128x32xi1> to vector<128x32xi32>
    %15 = arith.sitofp %14 : vector<128x32xi32> to vector<128x32xf32>
    %cst = arith.constant 5.000000e-01 : f32
    %16 = vector.broadcast %cst : f32 to vector<128x32xf32>
    %17 = arith.mulf %15, %16 : vector<128x32xf32>
    %cst_4 = arith.constant dense<0.000000e+00> : vector<8x32xf32>
    %18 = tpu.matmul %3, %17, %cst_4 {dimension_numbers = #tpu.dot_dimension_numbers<[1], [0], [0], [1], [0, 0, 1, 1], [], []>} : vector<8x128xf32>, vector<128x32xf32>, vector<8x32xf32> -> vector<8x32xf32>
    %cst_5 = arith.constant 9.99999997E-7 : f32
    %19 = vector.broadcast %cst_5 : f32 to vector<8x32xf32>
    %20 = arith.addf %18, %19 : vector<8x32xf32>
    %21 = math.sqrt %20 : vector<8x32xf32>
    %cst_6 = arith.constant -7.812500e-02 : f32
    %22 = vector.broadcast %cst_6 : f32 to vector<8x32xf32>
    %23 = arith.mulf %21, %22 : vector<8x32xf32>
    %24 = math.exp %23 : vector<8x32xf32>
    %cst_7 = arith.constant 1.000000e+00 : f32
    %25 = vector.broadcast %cst_7 : f32 to vector<8x32xf32>
    %26 = arith.subf %25, %24 : vector<8x32xf32>
    %cst_8 = arith.constant 1.000000e+00 : f32
    %27 = vector.broadcast %cst_8 : f32 to vector<8x32xf32>
    %28 = arith.mulf %27, %26 : vector<8x32xf32>
    %c0_9 = arith.constant 0 : index
    %c0_10 = arith.constant 0 : index
    %29 = vector.load %arg3[%c0_9, %c0_10] : memref<8x32xf32, #tpu.memory_space<vmem>>, vector<8x32xf32>
    tpu.vector_store %arg3[%c0_9, %c0_10], %28 {strides = array<i32>} : memref<8x32xf32, #tpu.memory_space<vmem>>, vector<8x32xf32>,
    return
  }
  func.func @transform_0(%arg0: i32) -> (i32, i32) {
    %c0_i32 = arith.constant 0 : i32
    %c0_i32_0 = arith.constant 0 : i32
    return %arg0, %c0_i32 : i32, i32
  }
  func.func @transform_1(%arg0: i32) -> (i32, i32) {
    %c0_i32 = arith.constant 0 : i32
    %c0_i32_0 = arith.constant 0 : i32
    return %arg0, %c0_i32 : i32, i32
  }
  func.func @transform_2(%arg0: i32) -> (i32, i32) {
    %c0_i32 = arith.constant 0 : i32
    %c0_i32_0 = arith.constant 0 : i32
    return %arg0, %c0_i32 : i32, i32
  }
}

</mosaic_0001>

<bundles_post_ra>
// kernel: _wasserstein_loss_impl.1
= control target key start
LH: loop header
LB: loop body
LE: loop exit
PB: predicated region body
PF: predicated region fallthrough
CT: control target
= control target key end

     0   :  { %v15_v0 = vlaneseq  ;;  %v210_v19 = vmov 0.0   ;;  %s292_s0 = inlined_call_operand.vmem [shape: f32[8,128], index: 0, kind: input, shape index: {}]   ;;  %s293_s1 = inlined_call_operand.vmem [shape: f32[8,128], index: 1, kind: input, shape index: {}]   ;;  %s294_s2 = inlined_call_operand.vmem [shape: f32[8,32], index: 2, kind: output, shape index: {}]  }
   0x1   :  { %v11_v63 = vld [vmem:[%s292_s0] sm:$0xff] }
   0x2   :  { %v226_v1 = vshrl.u32 %v15_v0, 7  ;;  %v33_v2 = vand.u32 127, %v15_v0  ;;  %v12_v0 = vld [vmem:[%s293_s1] sm:$0xff] }
   0x4   :  { %v31_v3 = vadd.s32 120, %v226_v1  ;;  %v229_v4 = vmul.u32 4, %v33_v2  ;;  %v30_v5 = vadd.s32 112, %v226_v1  ;;  %v29_v6 = vadd.s32 104, %v226_v1 }
   0x5   :  { %v28_v7 = vadd.s32 96, %v226_v1  ;;  %v27_v8 = vadd.s32 88, %v226_v1  ;;  %v26_v9 = vadd.s32 80, %v226_v1  ;;  %v25_v10 = vadd.s32 72, %v226_v1 }
   0x6   :  { %v50_v11 = vsub.s32 %v31_v3, %v229_v4  ;;  %v49_v12 = vsub.s32 %v30_v5, %v229_v4  ;;  %v48_v13 = vsub.s32 %v29_v6, %v229_v4  ;;  %v24_v14 = vadd.s32 64, %v226_v1 }
   0x7   :  { %v47_v15 = vsub.s32 %v28_v7, %v229_v4  ;;  %v46_v16 = vsub.s32 %v27_v8, %v229_v4  ;;  %v45_v17 = vsub.s32 %v26_v9, %v229_v4  ;;  %v44_v18 = vsub.s32 %v25_v10, %v229_v4 }
   0x8   :  { %vm66_vm0 = vcmp.ge.s32.totalorder %v50_v11, 0  ;;  %vm82_vm1 = vcmp.lt.s32.totalorder %v50_v11, 4  ;;  %vm65_vm2 = vcmp.ge.s32.totalorder %v49_v12, 0  ;;  %vm81_vm3 = vcmp.lt.s32.totalorder %v49_v12, 4 }
   0x9   :  { %vm98_vm4 = vmand %vm66_vm0, %vm82_vm1  ;;  %vm64_vm5 = vcmp.ge.s32.totalorder %v48_v13, 0  ;;  %vm80_vm6 = vcmp.lt.s32.totalorder %v48_v13, 4  ;;  %vm63_vm7 = vcmp.ge.s32.totalorder %v47_v15, 0  ;;  %vm79_vm8 = vcmp.lt.s32.totalorder %v47_v15, 4 }
   0xa   :  { %v204_v20 = vsel %vm98_vm4, 1.0, %v210_v19  ;;  %vm97_vm9 = vmand %vm65_vm2, %vm81_vm3  ;;  %vm62_vm10 = vcmp.ge.s32.totalorder %v46_v16, 0  ;;  %vm78_vm11 = vcmp.lt.s32.totalorder %v46_v16, 4  ;;  %vm61_vm12 = vcmp.ge.s32.totalorder %v45_v17, 0 }
   0xb   :  { %v146_v21 = vmul.f32 0.5, %v204_v20  ;;  %v203_v22 = vsel %vm97_vm9, 1.0, %v210_v19  ;;  %vm96_vm13 = vmand %vm64_vm5, %vm80_vm6  ;;  %vm77_vm14 = vcmp.lt.s32.totalorder %v45_v17, 4  ;;  %vm60_vm15 = vcmp.ge.s32.totalorder %v44_v18, 0 }
   0xc   :  { %v145_v23 = vmul.f32 0.5, %v203_v22  ;;  %v202_v24 = vsel %vm96_vm13, 1.0, %v210_v19  ;;  %vm95_vm0 = vmand %vm63_vm7, %vm79_vm8  ;;  %vm76_vm1 = vcmp.lt.s32.totalorder %v44_v18, 4  ;;  %v43_v25 = vsub.s32 %v24_v14, %v229_v4 }
   0xd   :  { %147 = vmatpush.msra.mxu0 %v146_v21  ;;  %v144_v26 = vmul.f32 0.5, %v202_v24  ;;  %v201_v27 = vsel %vm95_vm0, 1.0, %v210_v19  ;;  %vm94_vm2 = vmand %vm62_vm10, %vm78_vm11  ;;  %v23_v28 = vadd.s32 56, %v226_v1  ;;  %v22_v29 = vadd.s32 48, %v226_v1 }
   0xe   :  { %v200_v30 = vsel %vm94_vm2, 1.0, %v210_v19  ;;  %vm93_vm3 = vmand %vm61_vm12, %vm77_vm14  ;;  %vm59_vm4 = vcmp.ge.s32.totalorder %v43_v25, 0  ;;  %vm75_vm5 = vcmp.lt.s32.totalorder %v43_v25, 4  ;;  %v143_v31 = vmul.f32 0.5, %v201_v27 }
   0xf   :  { %148 = vmatpush.msra.mxu0 %v145_v23  ;;  %vm92_vm6 = vmand %vm60_vm15, %vm76_vm1  ;;  %v42_v32 = vsub.s32 %v23_v28, %v229_v4  ;;  %v41_v33 = vsub.s32 %v22_v29, %v229_v4  ;;  %v199_v34 = vsel %vm93_vm3, 1.0, %v210_v19  ;;  %v21_v35 = vadd.s32 40, %v226_v1 }
  0x10   :  { %v20_v36 = vadd.s32 32, %v226_v1  ;;  %v142_v37 = vmul.f32 0.5, %v200_v30  ;;  %vm91_vm7 = vmand %vm59_vm4, %vm75_vm5  ;;  %v198_v38 = vsel %vm92_vm6, 1.0, %v210_v19  ;;  %v141_v40 = vmul.f32 0.5, %v199_v34 }
  0x11   :  { %149 = vmatpush.msra.mxu0 %v144_v26  ;;  %vm58_vm8 = vcmp.ge.s32.totalorder %v42_v32, 0  ;;  %vm74_vm9 = vcmp.lt.s32.totalorder %v42_v32, 4  ;;  %vm57_vm11 = vcmp.ge.s32.totalorder %v41_v33, 0  ;;  %vm73_vm12 = vcmp.lt.s32.totalorder %v41_v33, 4 }
  0x12   :  { %vm90_vm10 = vmand %vm58_vm8, %vm74_vm9  ;;  %v40_v39 = vsub.s32 %v21_v35, %v229_v4  ;;  %v39_v41 = vsub.s32 %v20_v36, %v229_v4  ;;  %v19_v42 = vadd.s32 24, %v226_v1  ;;  %v18_v43 = vadd.s32 16, %v226_v1 }
  0x13   :  { %150 = vmatpush.msra.mxu0 %v143_v31  ;;  %v197_v44 = vsel %vm91_vm7, 1.0, %v210_v19  ;;  %v140_v45 = vmul.f32 0.5, %v198_v38  ;;  %v196_v46 = vsel %vm90_vm10, 1.0, %v210_v19  ;;  %vm89_vm15 = vmand %vm57_vm11, %vm73_vm12  ;;  %v17_v49 = vadd.s32 8, %v226_v1 }
  0x14   :  { %vm56_vm13 = vcmp.ge.s32.totalorder %v40_v39, 0  ;;  %vm72_vm14 = vcmp.lt.s32.totalorder %v40_v39, 4  ;;  %v38_v47 = vsub.s32 %v19_v42, %v229_v4  ;;  %vm55_vm0 = vcmp.ge.s32.totalorder %v39_v41, 0 }
  0x15   :  { %151 = vmatpush.msra.mxu0 %v142_v37  ;;  %vm71_vm1 = vcmp.lt.s32.totalorder %v39_v41, 4  ;;  %v37_v48 = vsub.s32 %v18_v43, %v229_v4  ;;  %v139_v50 = vmul.f32 0.5, %v197_v44  ;;  %vm88_vm2 = vmand %vm56_vm13, %vm72_vm14  ;;  %v195_v51 = vsel %vm89_vm15, 1.0, %v210_v19 }
  0x16   :  { %vm54_vm3 = vcmp.ge.s32.totalorder %v38_v47, 0  ;;  %vm70_vm4 = vcmp.lt.s32.totalorder %v38_v47, 4  ;;  %v36_v52 = vsub.s32 %v17_v49, %v229_v4  ;;  %v138_v53 = vmul.f32 0.5, %v196_v46  ;;  %vm87_vm5 = vmand %vm55_vm0, %vm71_vm1 }
  0x17   :  { %152 = vmatpush.msra.mxu0 %v141_v40  ;;  %v194_v54 = vsel %vm88_vm2, 1.0, %v210_v19  ;;  %vm53_vm6 = vcmp.ge.s32.totalorder %v37_v48, 0  ;;  %vm69_vm7 = vcmp.lt.s32.totalorder %v37_v48, 4  ;;  %v35_v55 = vsub.s32 %v226_v1, %v229_v4  ;;  %vm86_vm8 = vmand %vm54_vm3, %vm70_vm4 }
  0x18   :  { %v137_v56 = vmul.f32 0.5, %v195_v51  ;;  %v193_v57 = vsel %vm87_vm5, 1.0, %v210_v19  ;;  %vm52_vm9 = vcmp.ge.s32.totalorder %v36_v52, 0  ;;  %vm68_vm10 = vcmp.lt.s32.totalorder %v36_v52, 4  ;;  %vm85_vm11 = vmand %vm53_vm6, %vm69_vm7 }
  0x19   :  { %153 = vmatpush.msra.mxu0 %v140_v45  ;;  %v136_v58 = vmul.f32 0.5, %v194_v54  ;;  %v192_v59 = vsel %vm86_vm8, 1.0, %v210_v19  ;;  %vm51_vm12 = vcmp.ge.s32.totalorder %v35_v55, 0  ;;  %vm67_vm13 = vcmp.lt.s32.totalorder %v35_v55, 4  ;;  %vm84_vm14 = vmand %vm52_vm9, %vm68_vm10 }
  0x1a   :  { %v135_v60 = vmul.f32 0.5, %v193_v57  ;;  %v191_v61 = vsel %vm85_vm11, 1.0, %v210_v19  ;;  %v134_v62 = vmul.f32 0.5, %v192_v59  ;;  %vm83_vm15 = vmand %vm51_vm12, %vm67_vm13  ;;  %v190_v1 = vsel %vm84_vm14, 1.0, %v210_v19 }
  0x1b   :  { %154 = vmatpush.msra.mxu0 %v139_v50  ;;  %v133_v2 = vmul.f32 0.5, %v191_v61  ;;  %v189_v3 = vsel %vm83_vm15, 1.0, %v210_v19  ;;  %v13_v4 = vsub.f32 %v11_v63, %v12_v0  ;;  %v132_v5 = vmul.f32 0.5, %v190_v1 }
  0x1c   :  { %v131_v6 = vmul.f32 0.5, %v189_v3  ;;  %vm183_vm2 = vcmask 261120  }
  0x1d   :  { %155 = vmatpush.msra.mxu0 %v138_v53  ;;  %v14_v7 = vmul.f32 %v13_v4, %v13_v4 }
  0x1f   :  { %156 = vmatpush.msra.mxu0 %v137_v56 }
  0x21   :  { %157 = vmatpush.msra.mxu0 %v136_v58 }
  0x23   :  { %158 = vmatpush.msra.mxu0 %v135_v60 }
  0x25   :  { %159 = vmatpush.msra.mxu0 %v134_v62 }
  0x27   :  { %160 = vmatpush.msra.mxu0 %v133_v2 }
  0x29   :  { %161 = vmatpush.msra.mxu0 %v132_v5 }
  0x2b   :  { %162 = vmatpush.msra.mxu0 %v131_v6 }
  0x2c   :  { %163 = vmatmul.f32.vlgmr.msra.gmra.mxu0 %v14_v7 }
  0xa9   :  { %v164_v8 = vpop.f32.mrf.mxu0 }
  0xaa   :  { %v165_v9 = vadd.f32 1e-06, %v164_v8 }
  0xac   :  { %206 = vrsqrt.f32 %v165_v9  ;;  %vm174_vm0 = vcmp.eq.f32.partialorder %v165_v9, inf  ;;  %v177_v17 = vand.u32 2147483648, %v165_v9  ;;  %vm176_vm1 = vcmp.eq.f32.partialorder %v165_v9, 0.0 }
  0xb2   :  { %v207_v10 = vpop.eup %206 }
  0xb3   :  { %v168_v11 = vmul.f32 %v207_v10, %v165_v9 }
  0xb5   :  { %v169_v12 = vmul.f32 %v207_v10, %v168_v11 }
  0xb7   :  { %v170_v13 = vmul.f32 0.5, %v169_v12 }
  0xb9   :  { %v171_v14 = vsub.f32 1.5, %v170_v13 }
  0xbb   :  { %v172_v15 = vmul.f32 %v207_v10, %v171_v14 }
  0xbd   :  { %v173_v16 = vmul.f32 %v172_v15, %v165_v9 }
  0xbf   :  { %v175_v18 = vsel %vm174_vm0, %v165_v9, %v173_v16 }
  0xc0   :  { %v178_v19 = vsel %vm176_vm1, %v177_v17, %v175_v18 }
  0xc1   :  { %v179_v20 = vmul.f32 -0.078125, %v178_v19 }
  0xc3   :  { %v180_v21 = vmul.f32 1.442695, %v179_v20 }
  0xc5   :  { %208 = vpow2.f32 %v180_v21 }
  0xcb   :  { %v209_v22 = vpop.eup %208 }
  0xcc   :  { %v182_v23 = vsub.f32 1.0, %v209_v22 }
  0xce   :  { %184 = vst.msk [vmem:[%s294_s2] sm:$0xff] %vm183_vm2, %v182_v23 }

</bundles_post_ra>
